<compile_context>
chip_gen: v6e
topology: v6e:2x2x1
jax: 0.10.0
libtpu: 0.0.40
codegen_flags: <defaults>
</compile_context>

<pallas_src>
import math

import jax
import jax.numpy as jnp
import numpy as np
from jax.experimental import pallas as pl
from jax.experimental.pallas import tpu as pltpu

FEATURE_DIM = 32      # small, consistent with the module (default 64)
T_BATCHSIZE = 32      # -> t_sigma_num = 32 // 16 = 2, repeat factor = 16
T_VAR = 1.0
T_SIGMA_NUM = T_BATCHSIZE // 16
BN_EPS = 1e-5


def samplenet_kernel(x_ref, w_ref, bn_ref, o_ref):
    """Single-block kernel: 3x (Linear(no-bias) -> BatchNorm1d(train) -> act).

    x_ref : (n, D)       input noise block
    w_ref : (3, D, D)    per-layer weights, already transposed to (in, out)
    bn_ref: (6, D)       rows [g1, be1, g2, be2, g3, be3]
    o_ref : (n, D)       pre-repeat output block
    """

    def layer(a, i, act):
        # Linear without bias (bias cancels under training-mode BN).
        y = jnp.dot(a, w_ref[i], preferred_element_type=jnp.float32)
        # Independent reductions -> one-pass biased batch variance.
        mu = jnp.mean(y, axis=0, keepdims=True)            # (1, D)
        msq = jnp.mean(y * y, axis=0, keepdims=True)       # (1, D)
        var = msq - mu * mu
        g = bn_ref[pl.ds(2 * i, 1), :]                     # (1, D)
        be = bn_ref[pl.ds(2 * i + 1, 1), :]                # (1, D)
        scale = g * jax.lax.rsqrt(var + BN_EPS)
        shift = be - mu * scale
        return act(y * scale + shift)

    leaky = lambda z: jnp.where(z > 0, z, 0.2 * z)          # LeakyReLU(0.2)

    a = x_ref[...]
    a = layer(a, 0, leaky)
    a = layer(a, 1, leaky)
    a = layer(a, 2, jnp.tanh)
    o_ref[...] = a.astype(o_ref.dtype)


def samplenet_forward(x, params):
    """x: (t_sigma_num, D).  params: list of 3 tuples (W(out,in), b, gamma, beta)."""
    n, d = x.shape
    rep = T_BATCHSIZE // n

    # Pack parameters into 2 slabs -> 3 input DMAs total (x, W, BN).
    w_stack = jnp.stack(
        [jnp.asarray(w, jnp.float32).T for (w, _, _, _) in params])        # (3, d, d) as (in, out)
    bn_rows = []
    for (_, _, g, be) in params:
        bn_rows.append(jnp.asarray(g, jnp.float32))
        bn_rows.append(jnp.asarray(be, jnp.float32))
    bn_stack = jnp.stack(bn_rows)                                          # (6, d)

    vmem = pl.BlockSpec(memory_space=pltpu.MemorySpace.VMEM)
    out = pl.pallas_call(
        samplenet_kernel,
        out_shape=jax.ShapeDtypeStruct((n, d), jnp.float32),
        in_specs=[vmem, vmem, vmem],
        out_specs=vmem,
    )(x.astype(jnp.float32), w_stack, bn_stack)

    # torch .repeat(rep, 1): whole (n, d) block stacked rep times along batch.
    return jnp.tile(out, (rep, 1))


def _reference_forward(x, params):
    """Pure-JAX reference (keeps the Linear bias; BN cancels it exactly)."""
    a = x.astype(jnp.float32)
    acts = [lambda z: jnp.where(z > 0, z, 0.2 * z)] * 2 + [jnp.tanh]
    for (w, b, g, be), act in zip(params, acts):
        y = a @ jnp.asarray(w, jnp.float32).T + b
        mu = jnp.mean(y, axis=0, keepdims=True)
        var = jnp.mean((y - mu) ** 2, axis=0, keepdims=True)
        y = (y - mu) / jnp.sqrt(var + BN_EPS) * g + be
        a = act(y)
    rep = T_BATCHSIZE // x.shape[0]
    return jnp.tile(a, (rep, 1))


def _init_params(key, d):
    """Deterministic init mimicking the module's __init__ shapes:
       3x [ Linear(d, d) weight (d,d) + bias (d,), BatchNorm1d(d) gamma=1, beta=0 ]."""
    params = []
    bound = 1.0 / math.sqrt(d)
    for _ in range(3):
        kw, kb, key = jax.random.split(key, 3)
        w = jax.random.uniform(kw, (d, d), jnp.float32, -bound, bound)
        b = jax.random.uniform(kb, (d,), jnp.float32, -bound, bound)
        gamma = jnp.ones((d,), jnp.float32)
        beta = jnp.zeros((d,), jnp.float32)
        params.append((w, b, gamma, beta))
    return params


if __name__ == "__main__":
    key = jax.random.PRNGKey(0)
    k_in, k_par = jax.random.split(key)

    # t_sigma_num > 0 branch: input is randn(t_sigma_num, feature_dim) * sqrt(t_var)
    # TODO(synk): torch.randn inside forward() is reproduced host-side with jax.random.
    x = jax.random.normal(k_in, (T_SIGMA_NUM, FEATURE_DIM), jnp.float32) * math.sqrt(T_VAR)
    params = _init_params(k_par, FEATURE_DIM)

    out = samplenet_forward(x, params)
    out = jax.block_until_ready(out)

    assert out.shape == (T_BATCHSIZE, FEATURE_DIM), out.shape

    ref = jax.block_until_ready(_reference_forward(x, params))
    np.testing.assert_allclose(np.asarray(out), np.asarray(ref), rtol=2e-3, atol=2e-3)

    print("KERNEL_OK")
</pallas_src>

<mosaic_0001>
module attributes {stable_mosaic.version = 11 : i64} {
  func.func @samplenet_kernel(%arg0: memref<2x32xf32, #tpu.memory_space<vmem>>, %arg1: memref<3x32x32xf32, #tpu.memory_space<vmem>>, %arg2: memref<6x32xf32, #tpu.memory_space<vmem>>, %arg3: memref<2x32xf32, #tpu.memory_space<vmem>>) attributes {dimension_semantics = [], scalar_prefetch = 0 : i64, scratch_operands = 0 : i64, tpu.core_type = #tpu.core_type<tc>} {
    %c0 = arith.constant 0 : index
    %c0_0 = arith.constant 0 : index
    %0 = vector.load %arg0[%c0, %c0_0] : memref<2x32xf32, #tpu.memory_space<vmem>>, vector<2x32xf32>
    %c0_1 = arith.constant 0 : index
    %c0_2 = arith.constant 0 : index
    %c0_3 = arith.constant 0 : index
    %1 = vector.load %arg1[%c0_1, %c0_2, %c0_3] : memref<3x32x32xf32, #tpu.memory_space<vmem>>, vector<1x32x32xf32>
    %2 = vector.shape_cast %1 : vector<1x32x32xf32> to vector<32x32xf32>
    %cst = arith.constant dense<0.000000e+00> : vector<2x32xf32>
    %3 = tpu.matmul %0, %2, %cst {dimension_numbers = #tpu.dot_dimension_numbers<[1], [0], [0], [1], [0, 0, 1, 1], [], []>} : vector<2x32xf32>, vector<32x32xf32>, vector<2x32xf32> -> vector<2x32xf32>
    %cst_4 = arith.constant dense<0.000000e+00> : vector<32xf32>
    %4 = vector.multi_reduction <add>, %3, %cst_4 [0] : vector<2x32xf32> to vector<32xf32>
    %5 = vector.shape_cast %4 : vector<32xf32> to vector<1x32xf32>
    %cst_5 = arith.constant 2.000000e+00 : f32
    %6 = vector.broadcast %cst_5 : f32 to vector<1x32xf32>
    %7 = arith.divf %5, %6 : vector<1x32xf32>
    %8 = arith.mulf %3, %3 : vector<2x32xf32>
    %cst_6 = arith.constant dense<0.000000e+00> : vector<32xf32>
    %9 = vector.multi_reduction <add>, %8, %cst_6 [0] : vector<2x32xf32> to vector<32xf32>
    %10 = vector.shape_cast %9 : vector<32xf32> to vector<1x32xf32>
    %cst_7 = arith.constant 2.000000e+00 : f32
    %11 = vector.broadcast %cst_7 : f32 to vector<1x32xf32>
    %12 = arith.divf %10, %11 : vector<1x32xf32>
    %13 = arith.mulf %7, %7 : vector<1x32xf32>
    %14 = arith.subf %12, %13 : vector<1x32xf32>
    %c0_8 = arith.constant 0 : index
    %c0_9 = arith.constant 0 : index
    %15 = vector.load %arg2[%c0_8, %c0_9] : memref<6x32xf32, #tpu.memory_space<vmem>>, vector<1x32xf32>
    %c1 = arith.constant 1 : index
    %c0_10 = arith.constant 0 : index
    %16 = vector.load %arg2[%c1, %c0_10] : memref<6x32xf32, #tpu.memory_space<vmem>>, vector<1x32xf32>
    %cst_11 = arith.constant 9.99999974E-6 : f32
    %17 = vector.broadcast %cst_11 : f32 to vector<1x32xf32>
    %18 = arith.addf %14, %17 : vector<1x32xf32>
    %19 = math.rsqrt %18 : vector<1x32xf32>
    %20 = arith.mulf %15, %19 : vector<1x32xf32>
    %21 = arith.mulf %7, %20 : vector<1x32xf32>
    %22 = arith.subf %16, %21 : vector<1x32xf32>
    %23 = vector.broadcast %20 : vector<1x32xf32> to vector<2x32xf32>
    %24 = arith.mulf %3, %23 : vector<2x32xf32>
    %25 = vector.broadcast %22 : vector<1x32xf32> to vector<2x32xf32>
    %26 = arith.addf %24, %25 : vector<2x32xf32>
    %cst_12 = arith.constant 0.000000e+00 : f32
    %27 = vector.broadcast %cst_12 : f32 to vector<2x32xf32>
    %28 = arith.cmpf ogt, %26, %27 : vector<2x32xf32>
    %cst_13 = arith.constant 2.000000e-01 : f32
    %29 = vector.broadcast %cst_13 : f32 to vector<2x32xf32>
    %30 = arith.mulf %29, %26 : vector<2x32xf32>
    %31 = arith.select %28, %26, %30 : vector<2x32xi1>, vector<2x32xf32>
    %c1_14 = arith.constant 1 : index
    %c0_15 = arith.constant 0 : index
    %c0_16 = arith.constant 0 : index
    %32 = vector.load %arg1[%c1_14, %c0_15, %c0_16] : memref<3x32x32xf32, #tpu.memory_space<vmem>>, vector<1x32x32xf32>
    %33 = vector.shape_cast %32 : vector<1x32x32xf32> to vector<32x32xf32>
    %cst_17 = arith.constant dense<0.000000e+00> : vector<2x32xf32>
    %34 = tpu.matmul %31, %33, %cst_17 {dimension_numbers = #tpu.dot_dimension_numbers<[1], [0], [0], [1], [0, 0, 1, 1], [], []>} : vector<2x32xf32>, vector<32x32xf32>, vector<2x32xf32> -> vector<2x32xf32>
    %cst_18 = arith.constant dense<0.000000e+00> : vector<32xf32>
    %35 = vector.multi_reduction <add>, %34, %cst_18 [0] : vector<2x32xf32> to vector<32xf32>
    %36 = vector.shape_cast %35 : vector<32xf32> to vector<1x32xf32>
    %cst_19 = arith.constant 2.000000e+00 : f32
    %37 = vector.broadcast %cst_19 : f32 to vector<1x32xf32>
    %38 = arith.divf %36, %37 : vector<1x32xf32>
    %39 = arith.mulf %34, %34 : vector<2x32xf32>
    %cst_20 = arith.constant dense<0.000000e+00> : vector<32xf32>
    %40 = vector.multi_reduction <add>, %39, %cst_20 [0] : vector<2x32xf32> to vector<32xf32>
    %41 = vector.shape_cast %40 : vector<32xf32> to vector<1x32xf32>
    %cst_21 = arith.constant 2.000000e+00 : f32
    %42 = vector.broadcast %cst_21 : f32 to vector<1x32xf32>
    %43 = arith.divf %41, %42 : vector<1x32xf32>
    %44 = arith.mulf %38, %38 : vector<1x32xf32>
    %45 = arith.subf %43, %44 : vector<1x32xf32>
    %c2 = arith.constant 2 : index
    %c0_22 = arith.constant 0 : index
    %46 = vector.load %arg2[%c2, %c0_22] : memref<6x32xf32, #tpu.memory_space<vmem>>, vector<1x32xf32>
    %c3 = arith.constant 3 : index
    %c0_23 = arith.constant 0 : index
    %47 = vector.load %arg2[%c3, %c0_23] : memref<6x32xf32, #tpu.memory_space<vmem>>, vector<1x32xf32>
    %cst_24 = arith.constant 9.99999974E-6 : f32
    %48 = vector.broadcast %cst_24 : f32 to vector<1x32xf32>
    %49 = arith.addf %45, %48 : vector<1x32xf32>
    %50 = math.rsqrt %49 : vector<1x32xf32>
    %51 = arith.mulf %46, %50 : vector<1x32xf32>
    %52 = arith.mulf %38, %51 : vector<1x32xf32>
    %53 = arith.subf %47, %52 : vector<1x32xf32>
    %54 = vector.broadcast %51 : vector<1x32xf32> to vector<2x32xf32>
    %55 = arith.mulf %34, %54 : vector<2x32xf32>
    %56 = vector.broadcast %53 : vector<1x32xf32> to vector<2x32xf32>
    %57 = arith.addf %55, %56 : vector<2x32xf32>
    %cst_25 = arith.constant 0.000000e+00 : f32
    %58 = vector.broadcast %cst_25 : f32 to vector<2x32xf32>
    %59 = arith.cmpf ogt, %57, %58 : vector<2x32xf32>
    %cst_26 = arith.constant 2.000000e-01 : f32
    %60 = vector.broadcast %cst_26 : f32 to vector<2x32xf32>
    %61 = arith.mulf %60, %57 : vector<2x32xf32>
    %62 = arith.select %59, %57, %61 : vector<2x32xi1>, vector<2x32xf32>
    %c2_27 = arith.constant 2 : index
    %c0_28 = arith.constant 0 : index
    %c0_29 = arith.constant 0 : index
    %63 = vector.load %arg1[%c2_27, %c0_28, %c0_29] : memref<3x32x32xf32, #tpu.memory_space<vmem>>, vector<1x32x32xf32>
    %64 = vector.shape_cast %63 : vector<1x32x32xf32> to vector<32x32xf32>
    %cst_30 = arith.constant dense<0.000000e+00> : vector<2x32xf32>
    %65 = tpu.matmul %62, %64, %cst_30 {dimension_numbers = #tpu.dot_dimension_numbers<[1], [0], [0], [1], [0, 0, 1, 1], [], []>} : vector<2x32xf32>, vector<32x32xf32>, vector<2x32xf32> -> vector<2x32xf32>
    %cst_31 = arith.constant dense<0.000000e+00> : vector<32xf32>
    %66 = vector.multi_reduction <add>, %65, %cst_31 [0] : vector<2x32xf32> to vector<32xf32>
    %67 = vector.shape_cast %66 : vector<32xf32> to vector<1x32xf32>
    %cst_32 = arith.constant 2.000000e+00 : f32
    %68 = vector.broadcast %cst_32 : f32 to vector<1x32xf32>
    %69 = arith.divf %67, %68 : vector<1x32xf32>
    %70 = arith.mulf %65, %65 : vector<2x32xf32>
    %cst_33 = arith.constant dense<0.000000e+00> : vector<32xf32>
    %71 = vector.multi_reduction <add>, %70, %cst_33 [0] : vector<2x32xf32> to vector<32xf32>
    %72 = vector.shape_cast %71 : vector<32xf32> to vector<1x32xf32>
    %cst_34 = arith.constant 2.000000e+00 : f32
    %73 = vector.broadcast %cst_34 : f32 to vector<1x32xf32>
    %74 = arith.divf %72, %73 : vector<1x32xf32>
    %75 = arith.mulf %69, %69 : vector<1x32xf32>
    %76 = arith.subf %74, %75 : vector<1x32xf32>
    %c4 = arith.constant 4 : index
    %c0_35 = arith.constant 0 : index
    %77 = vector.load %arg2[%c4, %c0_35] : memref<6x32xf32, #tpu.memory_space<vmem>>, vector<1x32xf32>
    %c5 = arith.constant 5 : index
    %c0_36 = arith.constant 0 : index
    %78 = vector.load %arg2[%c5, %c0_36] : memref<6x32xf32, #tpu.memory_space<vmem>>, vector<1x32xf32>
    %cst_37 = arith.constant 9.99999974E-6 : f32
    %79 = vector.broadcast %cst_37 : f32 to vector<1x32xf32>
    %80 = arith.addf %76, %79 : vector<1x32xf32>
    %81 = math.rsqrt %80 : vector<1x32xf32>
    %82 = arith.mulf %77, %81 : vector<1x32xf32>
    %83 = arith.mulf %69, %82 : vector<1x32xf32>
    %84 = arith.subf %78, %83 : vector<1x32xf32>
    %85 = vector.broadcast %82 : vector<1x32xf32> to vector<2x32xf32>
    %86 = arith.mulf %65, %85 : vector<2x32xf32>
    %87 = vector.broadcast %84 : vector<1x32xf32> to vector<2x32xf32>
    %88 = arith.addf %86, %87 : vector<2x32xf32>
    %89 = math.tanh %88 : vector<2x32xf32>
    %c0_38 = arith.constant 0 : index
    %c0_39 = arith.constant 0 : index
    %90 = vector.load %arg3[%c0_38, %c0_39] : memref<2x32xf32, #tpu.memory_space<vmem>>, vector<2x32xf32>
    tpu.vector_store %arg3[%c0_38, %c0_39], %89 {strides = array<i32>} : memref<2x32xf32, #tpu.memory_space<vmem>>, vector<2x32xf32>,
    return
  }
}

</mosaic_0001>

<bundles_post_ra>
// kernel: tpu_custom_call.1
= control target key start
LH: loop header
LB: loop body
LE: loop exit
PB: predicated region body
PF: predicated region fallthrough
CT: control target
= control target key end

     0   :  { %8 = vsyncpa [#allocation3], 0  ;;  %s650_s0 = inlined_call_operand.hbm [shape: f32[2,32], index: 0, kind: input, shape index: {}]   ;;  %s651_s1 = inlined_call_operand.hbm [shape: f32[3,32,32], index: 1, kind: input, shape index: {}]   ;;  %s652_s2 = inlined_call_operand.hbm [shape: f32[6,32], index: 2, kind: input, shape index: {}]   ;;  %s653_s3 = inlined_call_operand.hbm [shape: f32[2,32], index: 3, kind: output, shape index: {}]  }
   0x1   :  { %9 = vsyncpa [#allocation6], 0 }
   0x2   :  { %10 = vsyncpa [#allocation4], 0  ;;  %s574_s12 = smov [#allocation5]  }
   0x3   :  { %s26_s13 = sshll.u32 %s574_s12, 4  ;;  %s27_s13 = int_to_ptr.vmem [resolvable:$true] %s26_s13 }
   0x4   :  { %s496_s14 = scalar_lea.vmem %s27_s13, 1536  ;;  %p501_p1 = scmp.lt.s32.totalorder %s27_s13, %s27_s13 }
   0x5   :  { %p497_p0 = scmp.ne.s32.totalorder %s27_s13, %s496_s14  ;;  %p502_p2 = scmp.lt.s32.totalorder %s496_s14, %s496_s14 }
   0x7   :  { %p503_p3 = por %p502_p2, %p501_p1 }
   0x9   :  { %p504_p4 = pnand %p503_p3, %p497_p0 }
   0xb   :  { %507 = shalt.err (!%p504_p4)
}
   0xc   :  { %s575_s15 = smov 128   ;;  %s576_s16 = smov 8  }
   0xd   :  { %32 = dma.hbm_to_vmem [thread:$0]  %s651_s1, 1536, %s27_s13, [#allocation6], %s575_s15, %s575_s15, %s576_s16  }
   0xe   :  { %s577_s19 = smov [#allocation2]   ;;  %s578_s21 = smov [#allocation7]  }
   0xf   :  { %s17_s20 = sshll.u32 %s577_s19, 4  ;;  %s39_s22 = sshll.u32 %s578_s21, 4  ;;  %s18_s20 = int_to_ptr.vmem [resolvable:$true] %s17_s20  ;;  %s40_s22 = int_to_ptr.vmem [resolvable:$true] %s39_s22 }
  0x10   :  { %s516_s23 = scalar_lea.vmem %s18_s20, 32  ;;  %p521_p6 = scmp.lt.s32.totalorder %s18_s20, %s18_s20 }
  0x11   :  { %p517_p5 = scmp.ne.s32.totalorder %s18_s20, %s516_s23  ;;  %p522_p7 = scmp.lt.s32.totalorder %s516_s23, %s516_s23 }
  0x13   :  { %p523_p8 = por %p522_p7, %p521_p6 }
  0x15   :  { %p524_p9 = pnand %p523_p8, %p517_p5 }
  0x17   :  { %527 = shalt.err (!%p524_p9)
}
  0x18   :  { %20 = dma.hbm_to_vmem [thread:$0]  %s650_s0, 32, %s18_s20, [#allocation3]  }
  0x19   :  { %s536_s26 = scalar_lea.vmem %s40_s22, 128  ;;  %p541_p11 = scmp.lt.s32.totalorder %s40_s22, %s40_s22 }
  0x1a   :  { %p537_p10 = scmp.ne.s32.totalorder %s40_s22, %s536_s26  ;;  %p542_p12 = scmp.lt.s32.totalorder %s536_s26, %s536_s26 }
  0x1c   :  { %p543_p13 = por %p542_p12, %p541_p11 }
  0x1e   :  { %p544_p0 = pnand %p543_p13, %p537_p10 }
  0x20   :  { %547 = shalt.err (!%p544_p0)
}
  0x21   :  { %42 = dma.hbm_to_vmem [thread:$0]  %s652_s2, 128, %s40_s22, [#allocation6]  }
  0x22   :  { %568 = dma.done.wait [#allocation3], 32  }
  0x23   :  { %569 = vsyncadd [#allocation3], 4294967264 }
  0x24   :  { %570 = dma.done.wait [#allocation6], 1664  }
  0x25   :  { %571 = vsyncadd [#allocation6], 4294965632  ;;  %v579_v0 = vmov 0.0   ;;  %vm580_vm0 = vmmov 0   ;;  %v56_v1 = vld [vmem:[#allocation5 + $0x18] sm:$0xff]  ;;  %v55_v2 = vld [vmem:[#allocation5 + $0x10] sm:$0xff]  ;;  %v159_v32 = vlaneseq }
  0x26   :  { %439 = vmatprep.subr.mxu0 %v579_v0  ;;  %447 = vmatprep.mubr.msk.f32.mxu0 %vm580_vm0, %v579_v0  ;;  %v54_v3 = vld [vmem:[#allocation5 + $0x8] sm:$0xff]  ;;  %v53_v4 = vld [vmem:[#allocation5] sm:$0xff]  ;;  %v52_v5 = vld [vmem:[#allocation2] sm:$0x3]  ;;  %vm57_vm1 = vcmask 261120   ;;  %vm131_vm2 = vcmask 254976  }
  0x27   :  { %450 = vmatprep.subr.mxu1 %v579_v0  ;;  %458 = vmatprep.mubr.msk.f32.mxu1 %vm580_vm0, %v579_v0  ;;  %v176_v6 = vld [vmem:[#allocation5 + $0x38] sm:$0xff]  ;;  %v175_v7 = vld [vmem:[#allocation5 + $0x30] sm:$0xff]  ;;  %v174_v8 = vld [vmem:[#allocation5 + $0x28] sm:$0xff]  ;;  %v160_v33 = vshrl.u32 %v159_v32, 7  ;;  %s581_s0 = smov [#allocation8]  }
  0x28   :  { %440 = vmatpush3.msra.mxu0 %v56_v1  ;;  %451 = vmatpush3.msra.mxu1 %v176_v6  ;;  %v173_v9 = vld [vmem:[#allocation5 + $0x20] sm:$0xff]  ;;  %v293_v47 = vld [vmem:[#allocation5 + $0x58] sm:$0xff]  ;;  %v292_v48 = vld [vmem:[#allocation5 + $0x50] sm:$0xff]  ;;  %s411_s2 = sshll.u32 %s581_s0, 4  ;;  %s412_s2 = int_to_ptr.vmem [resolvable:$true] %s411_s2 }
  0x29   :  { %441 = vmatprep.subr.mxu0 %v579_v0  ;;  %452 = vmatprep.subr.mxu1 %v579_v0  ;;  %v152_v34 = vld [vmem:[#allocation7] sm:$0x1]  ;;  %v629_v35 = vsub.s32 0, %v160_v33  ;;  %v153_v38 = vld [vmem:[#allocation7 + $0x1] sm:$0x1]  ;;  %v291_v49 = vld [vmem:[#allocation5 + $0x48] sm:$0xff]  ;;  %p553_p2 = scmp.lt.s32.totalorder %s412_s2, %s412_s2 }
  0x2a   :  { %442 = vmatpush3.msra.mxu0 %v55_v2  ;;  %453 = vmatpush3.msra.mxu1 %v175_v7  ;;  %v290_v50 = vld [vmem:[#allocation5 + $0x40] sm:$0xff]  ;;  %s548_s28 = scalar_lea.vmem %s412_s2, 32 }
  0x2b   :  { %443 = vmatprep.subr.mxu0 %v579_v0  ;;  %454 = vmatprep.subr.mxu1 %v579_v0  ;;  %p549_p1 = scmp.ne.s32.totalorder %s412_s2, %s548_s28  ;;  %p554_p3 = scmp.lt.s32.totalorder %s548_s28, %s548_s28 }
  0x2c   :  { %444 = vmatpush3.msra.mxu0 %v54_v3  ;;  %455 = vmatpush3.msra.mxu1 %v174_v8 }
  0x2d   :  { %445 = vmatprep.subr.mxu0 %v579_v0  ;;  %456 = vmatprep.subr.mxu1 %v579_v0  ;;  %p555_p4 = por %p554_p3, %p553_p2 }
  0x2e   :  { %446 = vmatpush3.msra.mxu0 %v53_v4  ;;  %457 = vmatpush3.msra.mxu1 %v173_v9  ;;  %v269_v9 = vld [vmem:[#allocation7 + $0x2] sm:$0x1] }
  0x2f   :  { %448 = vmatmul.mubr.msk.f32.vlgmr.msra.gmra.mxu0 %vm57_vm1, %v52_v5  ;;  %461 = vmatprep.subr.mxu0 %v579_v0  ;;  %p556_p5 = pnand %p555_p4, %p549_p1 }
  0x30   :  { %469 = vmatprep.mubr.msk.f32.mxu0 %vm580_vm0, %v579_v0  ;;  %462 = vmatpush3.msra.mxu0 %v293_v47  ;;  %v387_v47 = vld [vmem:[#allocation7 + $0x5] sm:$0x1] }
  0x31   :  { %463 = vmatprep.subr.mxu0 %v579_v0 }
  0x32   :  { %464 = vmatpush3.msra.mxu0 %v292_v48 }
  0x33   :  { %465 = vmatprep.subr.mxu0 %v579_v0 }
  0x34   :  { %466 = vmatpush3.msra.mxu0 %v291_v49 }
  0x35   :  { %467 = vmatprep.subr.mxu0 %v579_v0 }
  0x36   :  { %468 = vmatpush3.msra.mxu0 %v290_v50 }
  0xef   :  { %v127_v10 = vpop.f32.mrf.mxu0 }
  0xf0   :  { %v132_v11 = vsel %vm131_vm2, %v127_v10, 0.0  ;;  %v141_v12 = vmul.f32 %v127_v10, %v127_v10 }
  0xf1   :  { %v133_v13 = vrot.slane %v132_v11, 4  ;;  %v449_v14 = vpop.f32.mrf.mxu0 }
  0xf2   :  { %v142_v15 = vsel %vm131_vm2, %v141_v12, 0.0  ;;  %v270_v12 = vld [vmem:[#allocation7 + $0x3] sm:$0x1] }
  0xf3   :  { %v134_v16 = vadd.f32 %v133_v13, %v132_v11  ;;  %v143_v17 = vrot.slane %v142_v15, 4 }
  0xf5   :  { %v135_v18 = vrot.slane %v134_v16, 2  ;;  %v144_v19 = vadd.f32 %v143_v17, %v142_v15 }
  0xf7   :  { %v136_v20 = vadd.f32 %v135_v18, %v134_v16  ;;  %v145_v21 = vrot.slane %v144_v19, 2 }
  0xf9   :  { %v137_v22 = vrot.slane %v136_v20, 1  ;;  %v146_v23 = vadd.f32 %v145_v21, %v144_v19 }
  0xfb   :  { %v138_v24 = vadd.f32 %v137_v22, %v136_v20  ;;  %v147_v25 = vrot.slane %v146_v23, 1 }
  0xfd   :  { %v140_v26 = vmul.f32 0.5, %v138_v24  ;;  %v148_v27 = vadd.f32 %v147_v25, %v146_v23 }
  0xff   :  { %v149_v28 = vmul.f32 0.5, %v148_v27  ;;  %v150_v29 = vmul.f32 %v140_v26, %v140_v26 }
 0x101   :  { %v151_v30 = vsub.f32 %v149_v28, %v150_v29 }
 0x103   :  { %v154_v31 = vadd.f32 1e-05, %v151_v30 }
 0x105   :  { %480 = vrsqrt.f32 %v154_v31 }
 0x112   :  { %v481_v36 = vpop.eup %480 }
 0x113   :  { %v156_v37 = vmul.f32 %v481_v36, %v152_v34 }
 0x115   :  { %v157_v39 = vmul.f32 %v156_v37, %v140_v26  ;;  %v162_v40 = vrot.slane %v156_v37, %v629_v35 }
 0x117   :  { %v158_v41 = vsub.f32 %v153_v38, %v157_v39  ;;  %v163_v42 = vmul.f32 %v162_v40, %v127_v10 }
 0x119   :  { %v167_v43 = vrot.slane %v158_v41, %v629_v35 }
 0x11b   :  { %v168_v44 = vadd.f32 %v167_v43, %v163_v42 }
 0x11d   :  { %vm169_vm3 = vcmp.gt.f32.partialorder %v168_v44, 0.0  ;;  %v170_v45 = vmul.f32 0.2, %v168_v44 }
 0x11f   :  { %v171_v46 = vsel %vm169_vm3, %v168_v44, %v170_v45  ;;  %v386_v44 = vld [vmem:[#allocation7 + $0x4] sm:$0x1] }
 0x120   :  { %459 = vmatmul.mubr.msk.f32.vlgmr.msra.gmra.mxu1 %vm57_vm1, %v171_v46 }
 0x1e0   :  { %v246_v51 = vpop.f32.mrf.mxu1 }
 0x1e1   :  { %v250_v52 = vsel %vm131_vm2, %v246_v51, 0.0  ;;  %v258_v53 = vmul.f32 %v246_v51, %v246_v51 }
 0x1e2   :  { %v251_v54 = vrot.slane %v250_v52, 4  ;;  %v460_v55 = vpop.f32.mrf.mxu1 }
 0x1e3   :  { %v259_v56 = vsel %vm131_vm2, %v258_v53, 0.0 }
 0x1e4   :  { %v252_v57 = vadd.f32 %v251_v54, %v250_v52  ;;  %v260_v58 = vrot.slane %v259_v56, 4 }
 0x1e6   :  { %v253_v59 = vrot.slane %v252_v57, 2  ;;  %v261_v60 = vadd.f32 %v260_v58, %v259_v56 }
 0x1e8   :  { %v254_v61 = vadd.f32 %v253_v59, %v252_v57  ;;  %v262_v62 = vrot.slane %v261_v60, 2 }
 0x1ea   :  { %v255_v63 = vrot.slane %v254_v61, 1  ;;  %v263_v1 = vadd.f32 %v262_v62, %v261_v60 }
 0x1ec   :  { %v256_v2 = vadd.f32 %v255_v63, %v254_v61  ;;  %v264_v3 = vrot.slane %v263_v1, 1 }
 0x1ee   :  { %v257_v0 = vmul.f32 0.5, %v256_v2  ;;  %v265_v4 = vadd.f32 %v264_v3, %v263_v1 }
 0x1f0   :  { %v266_v5 = vmul.f32 0.5, %v265_v4  ;;  %v267_v6 = vmul.f32 %v257_v0, %v257_v0 }
 0x1f2   :  { %v268_v7 = vsub.f32 %v266_v5, %v267_v6 }
 0x1f4   :  { %v271_v8 = vadd.f32 1e-05, %v268_v7 }
 0x1f6   :  { %482 = vrsqrt.f32 %v271_v8 }
 0x203   :  { %v483_v10 = vpop.eup %482 }
 0x204   :  { %v273_v11 = vmul.f32 %v483_v10, %v269_v9 }
 0x206   :  { %v274_v13 = vmul.f32 %v273_v11, %v257_v0  ;;  %v279_v14 = vrot.slane %v273_v11, %v629_v35 }
 0x208   :  { %v275_v15 = vsub.f32 %v270_v12, %v274_v13  ;;  %v280_v16 = vmul.f32 %v279_v14, %v246_v51 }
 0x20a   :  { %v284_v17 = vrot.slane %v275_v15, %v629_v35 }
 0x20c   :  { %v285_v18 = vadd.f32 %v284_v17, %v280_v16 }
 0x20e   :  { %v287_v19 = vmul.f32 0.2, %v285_v18  ;;  %vm286_vm4 = vcmp.gt.f32.partialorder %v285_v18, 0.0 }
 0x210   :  { %v288_v20 = vsel %vm286_vm4, %v285_v18, %v287_v19 }
 0x211   :  { %470 = vmatmul.mubr.msk.f32.vlgmr.msra.gmra.mxu0 %vm57_vm1, %v288_v20 }
 0x2d1   :  { %v363_v21 = vpop.f32.mrf.mxu0 }
 0x2d2   :  { %v367_v22 = vsel %vm131_vm2, %v363_v21, 0.0  ;;  %v375_v23 = vmul.f32 %v363_v21, %v363_v21 }
 0x2d3   :  { %v368_v24 = vrot.slane %v367_v22, 4  ;;  %v471_v25 = vpop.f32.mrf.mxu0 }
 0x2d4   :  { %v376_v26 = vsel %vm131_vm2, %v375_v23, 0.0 }
 0x2d5   :  { %v369_v27 = vadd.f32 %v368_v24, %v367_v22  ;;  %v377_v28 = vrot.slane %v376_v26, 4 }
 0x2d7   :  { %v370_v29 = vrot.slane %v369_v27, 2  ;;  %v378_v30 = vadd.f32 %v377_v28, %v376_v26 }
 0x2d9   :  { %v371_v31 = vadd.f32 %v370_v29, %v369_v27  ;;  %v379_v32 = vrot.slane %v378_v30, 2 }
 0x2db   :  { %v372_v33 = vrot.slane %v371_v31, 1  ;;  %v380_v34 = vadd.f32 %v379_v32, %v378_v30 }
 0x2dd   :  { %v373_v36 = vadd.f32 %v372_v33, %v371_v31  ;;  %v381_v37 = vrot.slane %v380_v34, 1 }
 0x2df   :  { %v374_v38 = vmul.f32 0.5, %v373_v36  ;;  %v382_v39 = vadd.f32 %v381_v37, %v380_v34 }
 0x2e1   :  { %v383_v40 = vmul.f32 0.5, %v382_v39  ;;  %v384_v41 = vmul.f32 %v374_v38, %v374_v38 }
 0x2e3   :  { %v385_v42 = vsub.f32 %v383_v40, %v384_v41 }
 0x2e5   :  { %v388_v43 = vadd.f32 1e-05, %v385_v42 }
 0x2e7   :  { %484 = vrsqrt.f32 %v388_v43 }
 0x2f4   :  { %v485_v45 = vpop.eup %484 }
 0x2f5   :  { %v390_v46 = vmul.f32 %v485_v45, %v386_v44 }
 0x2f7   :  { %v391_v48 = vmul.f32 %v390_v46, %v374_v38  ;;  %v396_v49 = vrot.slane %v390_v46, %v629_v35 }
 0x2f9   :  { %v392_v50 = vsub.f32 %v387_v47, %v391_v48  ;;  %v397_v51 = vmul.f32 %v396_v49, %v363_v21 }
 0x2fb   :  { %v401_v52 = vrot.slane %v392_v50, %v629_v35 }
 0x2fd   :  { %v402_v53 = vadd.f32 %v401_v52, %v397_v51 }
 0x2ff   :  { %486 = vtanh.f32 %v402_v53 }
 0x30c   :  { %v487_v54 = vpop.eup %486 }
 0x30d   :  { %404 = vst.msk [vmem:[#allocation8] sm:$0x3] %vm131_vm2, %v487_v54 }
 0x30e   :  { %559 = shalt.err (!%p556_p5)
}
 0x30f   :  { %414 = dma.vmem_to_hbm [thread:$0]  %s412_s2, 32, %s653_s3, [#allocation4]  }
 0x310   :  { %572 = dma.done.wait [#allocation4], 32  }
 0x311   :  { %573 = vsyncadd [#allocation4], 4294967264 }
 0x312   :  { %418 = vsyncpa [#allocation3], 1 }
 0x313   :  { %419 = vsyncpa [#allocation6], 1 }
 0x314   :  { %420 = vsyncpa [#allocation4], 1 }

</bundles_post_ra>
